<compile_context>
chip_gen: v7x
topology: tpu7x:2x2x1
jax: 0.10.0
libtpu: 0.0.40
codegen_flags: <defaults>
</compile_context>

<pallas_src>
import functools

import jax
import jax.numpy as jnp
from jax.experimental import pallas as pl
from jax.experimental.pallas import tpu as pltpu

HIDDEN_DIMS = (256, 128, 64, 32)  # network_head hidden widths


def _round_up(n, m):
    return ((n + m - 1) // m) * m


def _dnn_fused_kernel(x_ref,
                      w0_ref, b0_ref,
                      w1_ref, b1_ref,
                      w2_ref, b2_ref,
                      w3_ref, b3_ref,
                      w4_ref, b4_ref,
                      o_ref,
                      *, matmul_dtype):
    """Whole 5-layer MLP on one [TB, input_dim] batch tile.

    All hidden activations stay in VMEM; weights/biases are resident across
    grid steps (constant index maps).  Dots run in `matmul_dtype` (bf16 by
    default) with f32 accumulation; bias-add / ReLU epilogues stay f32.
    """
    x = x_ref[...].astype(matmul_dtype)
    h = jnp.dot(x, w0_ref[...], preferred_element_type=jnp.float32)
    h = jnp.maximum(h + b0_ref[...], 0.0)                       # Linear + ReLU
    h = jnp.dot(h.astype(matmul_dtype), w1_ref[...],
                preferred_element_type=jnp.float32) + b1_ref[...]
    # Dropout(p=0.1) -> identity in eval mode.
    h = jnp.dot(h.astype(matmul_dtype), w2_ref[...],
                preferred_element_type=jnp.float32) + b2_ref[...]
    h = jnp.dot(h.astype(matmul_dtype), w3_ref[...],
                preferred_element_type=jnp.float32) + b3_ref[...]
    h = jnp.dot(h.astype(matmul_dtype), w4_ref[...],
                preferred_element_type=jnp.float32) + b4_ref[...]
    o_ref[...] = h.astype(o_ref.dtype)


def dnn_forward(x, params, *, batch_tile=1024, matmul_dtype=jnp.bfloat16):
    """Forward pass of DNN.network_head (shared_network=None), fused kernel.

    x: [B, input_dim] float32
    params: list of 5 (w, b) pairs; w: [din, dout] float32, b: [1, dout] float32
    """
    B, input_dim = x.shape
    output_dim = params[-1][0].shape[1]
    dims = [input_dim, *HIDDEN_DIMS, output_dim]

    # Batch tile: divisible by 8 (sublane), large enough to amortize per-step
    # pipeline overhead; split into >=2 tiles when possible so both v7x
    # TensorCores are fed via the "parallel" grid axis.
    TB = min(batch_tile, _round_up(B, 8))
    if B > 8 and pl.cdiv(B, TB) < 2:
        TB = _round_up(pl.cdiv(B, 2), 8)
    n_tiles = pl.cdiv(B, TB)

    # No padding / slicing in the wrapper: feature axes use full-array block
    # dims, the batch axis overhangs on the last tile (independent rows; OOB
    # output rows are masked), so x and out each cross HBM exactly once.
    in_specs = [pl.BlockSpec((TB, input_dim), lambda i: (i, 0))]
    args = [x]
    for li, (w, b) in enumerate(params):
        din, dout = dims[li], dims[li + 1]
        args += [w.astype(matmul_dtype), b]
        in_specs += [
            pl.BlockSpec((din, dout), lambda i: (0, 0)),   # resident weights
            pl.BlockSpec((1, dout), lambda i: (0, 0)),     # resident bias (f32)
        ]

    # VMEM budget: double-buffered x/out tiles + (double-buffered) resident
    # weights/biases + f32/bf16 intermediates + headroom; clamped below v7x's
    # 64 MiB physical VMEM.
    wsize = jnp.dtype(matmul_dtype).itemsize
    x_bytes = TB * input_dim * 4
    out_bytes = TB * output_dim * 4
    w_bytes = sum(dims[i] * dims[i + 1] * wsize + dims[i + 1] * 4 for i in range(5))
    act_bytes = TB * sum(HIDDEN_DIMS) * (4 + wsize)
    vmem_bytes = int(2 * (x_bytes + out_bytes + w_bytes) + act_bytes + (8 << 20))
    vmem_bytes = min(vmem_bytes, 48 << 20)
    # TODO(synk): for very large input_dim, layer 0 needs a K-tiling grid axis
    # (accumulator scratch + pl.when init/finalize) instead of fully-resident W0.

    flops = 2 * B * sum(dims[i] * dims[i + 1] for i in range(5))
    bytes_accessed = B * (input_dim + output_dim) * 4 + w_bytes

    return pl.pallas_call(
        functools.partial(_dnn_fused_kernel, matmul_dtype=matmul_dtype),
        out_shape=jax.ShapeDtypeStruct((B, output_dim), jnp.float32),
        grid=(n_tiles,),
        in_specs=in_specs,
        out_specs=pl.BlockSpec((TB, output_dim), lambda i: (i, 0)),
        compiler_params=pltpu.CompilerParams(
            dimension_semantics=("parallel",),
            vmem_limit_bytes=vmem_bytes,
        ),
        cost_estimate=pl.CostEstimate(flops=flops, transcendentals=0,
                                      bytes_accessed=bytes_accessed),
    )(*args)


def init_dnn_params(key, input_dim, output_dim):
    """Deterministic init mimicking PyTorch nn.Linear default (U[-k, k], k=1/sqrt(fan_in))."""
    dims = [input_dim, *HIDDEN_DIMS, output_dim]
    params = []
    for i in range(len(dims) - 1):
        fan_in, fan_out = dims[i], dims[i + 1]
        key, kw, kb = jax.random.split(key, 3)
        bound = 1.0 / jnp.sqrt(jnp.asarray(fan_in, jnp.float32))
        w = jax.random.uniform(kw, (fan_in, fan_out), jnp.float32, -bound, bound)
        b = jax.random.uniform(kb, (1, fan_out), jnp.float32, -bound, bound)
        params.append((w, b))
    return params


def dnn_forward_ref(x, params, matmul_dtype=jnp.float32):
    """Pure-JAX reference (eval-mode dropout = identity), matched matmul dtype."""
    def mm(a, w):
        return jnp.dot(a.astype(matmul_dtype), w.astype(matmul_dtype),
                       preferred_element_type=jnp.float32)
    h = jnp.maximum(mm(x, params[0][0]) + params[0][1], 0.0)
    h = mm(h, params[1][0]) + params[1][1]
    h = mm(h, params[2][0]) + params[2][1]
    h = mm(h, params[3][0]) + params[3][1]
    return mm(h, params[4][0]) + params[4][1]


if __name__ == "__main__":
    key = jax.random.PRNGKey(0)
    key, kx, kp, kx2 = jax.random.split(key, 4)

    batch = 8
    input_dim = 64
    output_dim = 8

    params = init_dnn_params(kp, input_dim, output_dim)

    fwd_f32 = jax.jit(functools.partial(dnn_forward, matmul_dtype=jnp.float32))
    fwd_bf16 = jax.jit(functools.partial(dnn_forward, matmul_dtype=jnp.bfloat16))

    # Small batch, single tile, exact f32 path vs exact f32 reference.
    x = jax.random.normal(kx, (batch, input_dim), jnp.float32)
    out = jax.block_until_ready(fwd_f32(x, params))
    ref = dnn_forward_ref(x, params, jnp.float32)
    assert out.shape == (batch, output_dim)
    assert jnp.allclose(out, ref, atol=1e-4, rtol=1e-4), "mismatch vs f32 reference"

    # Larger, non-multiple-of-tile batch: exercises the multi-tile grid, the
    # overhanging last tile (no wrapper padding), and the bf16-MXU default.
    batch2 = 300
    x2 = jax.random.normal(kx2, (batch2, input_dim), jnp.float32)
    out2 = jax.block_until_ready(fwd_bf16(x2, params))
    ref2 = dnn_forward_ref(x2, params, jnp.bfloat16)
    assert out2.shape == (batch2, output_dim)
    assert jnp.allclose(out2, ref2, atol=1e-2, rtol=1e-2), "mismatch vs bf16 reference"
    # Loose sanity check against exact f32 module semantics.
    ref2_f32 = dnn_forward_ref(x2, params, jnp.float32)
    assert jnp.allclose(out2, ref2_f32, atol=0.1, rtol=0.1), "bf16 path diverged from f32 semantics"

    print("KERNEL_OK")
</pallas_src>

<mosaic_0001>
module attributes {stable_mosaic.version = 11 : i64} {
  func.func @_dnn_fused_kernel(%arg0: i32, %arg1: memref<8x64xf32, #tpu.memory_space<vmem>>, %arg2: memref<64x256xf32, #tpu.memory_space<vmem>>, %arg3: memref<1x256xf32, #tpu.memory_space<vmem>>, %arg4: memref<256x128xf32, #tpu.memory_space<vmem>>, %arg5: memref<1x128xf32, #tpu.memory_space<vmem>>, %arg6: memref<128x64xf32, #tpu.memory_space<vmem>>, %arg7: memref<1x64xf32, #tpu.memory_space<vmem>>, %arg8: memref<64x32xf32, #tpu.memory_space<vmem>>, %arg9: memref<1x32xf32, #tpu.memory_space<vmem>>, %arg10: memref<32x8xf32, #tpu.memory_space<vmem>>, %arg11: memref<1x8xf32, #tpu.memory_space<vmem>>, %arg12: memref<8x8xf32, #tpu.memory_space<vmem>>) attributes {dimension_semantics = [#tpu.dimension_semantics<parallel>], iteration_bounds = array<i64: 1>, scalar_prefetch = 0 : i64, scratch_operands = 0 : i64, tpu.core_type = #tpu.core_type<tc>, window_params = [{transform_indices = @transform_0, window_bounds = array<i64: 8, 64>}, {pipeline_mode = #tpu.pipeline_mode<synchronous>, transform_indices = @transform_1, window_bounds = array<i64: 64, 256>}, {pipeline_mode = #tpu.pipeline_mode<synchronous>, transform_indices = @transform_2, window_bounds = array<i64: 1, 256>}, {pipeline_mode = #tpu.pipeline_mode<synchronous>, transform_indices = @transform_3, window_bounds = array<i64: 256, 128>}, {pipeline_mode = #tpu.pipeline_mode<synchronous>, transform_indices = @transform_4, window_bounds = array<i64: 1, 128>}, {pipeline_mode = #tpu.pipeline_mode<synchronous>, transform_indices = @transform_5, window_bounds = array<i64: 128, 64>}, {pipeline_mode = #tpu.pipeline_mode<synchronous>, transform_indices = @transform_6, window_bounds = array<i64: 1, 64>}, {pipeline_mode = #tpu.pipeline_mode<synchronous>, transform_indices = @transform_7, window_bounds = array<i64: 64, 32>}, {pipeline_mode = #tpu.pipeline_mode<synchronous>, transform_indices = @transform_8, window_bounds = array<i64: 1, 32>}, {pipeline_mode = #tpu.pipeline_mode<synchronous>, transform_indices = @transform_9, window_bounds = array<i64: 32, 8>}, {pipeline_mode = #tpu.pipeline_mode<synchronous>, transform_indices = @transform_10, window_bounds = array<i64: 1, 8>}, {transform_indices = @transform_11, window_bounds = array<i64: 8, 8>}]} {
    %c0 = arith.constant 0 : index
    %c0_0 = arith.constant 0 : index
    %0 = vector.load %arg1[%c0, %c0_0] : memref<8x64xf32, #tpu.memory_space<vmem>>, vector<8x64xf32>
    %c0_1 = arith.constant 0 : index
    %c0_2 = arith.constant 0 : index
    %1 = vector.load %arg2[%c0_1, %c0_2] : memref<64x256xf32, #tpu.memory_space<vmem>>, vector<64x256xf32>
    %cst = arith.constant dense<0.000000e+00> : vector<8x256xf32>
    %2 = tpu.matmul %0, %1, %cst {dimension_numbers = #tpu.dot_dimension_numbers<[1], [0], [0], [1], [0, 0, 1, 1], [], []>} : vector<8x64xf32>, vector<64x256xf32>, vector<8x256xf32> -> vector<8x256xf32>
    %c0_3 = arith.constant 0 : index
    %c0_4 = arith.constant 0 : index
    %3 = vector.load %arg3[%c0_3, %c0_4] : memref<1x256xf32, #tpu.memory_space<vmem>>, vector<1x256xf32>
    %4 = vector.broadcast %3 : vector<1x256xf32> to vector<8x256xf32>
    %5 = arith.addf %2, %4 : vector<8x256xf32>
    %cst_5 = arith.constant 0.000000e+00 : f32
    %6 = vector.broadcast %cst_5 : f32 to vector<8x256xf32>
    %7 = arith.maximumf %5, %6 : vector<8x256xf32>
    %c0_6 = arith.constant 0 : index
    %c0_7 = arith.constant 0 : index
    %8 = vector.load %arg4[%c0_6, %c0_7] : memref<256x128xf32, #tpu.memory_space<vmem>>, vector<256x128xf32>
    %cst_8 = arith.constant dense<0.000000e+00> : vector<8x128xf32>
    %9 = tpu.matmul %7, %8, %cst_8 {dimension_numbers = #tpu.dot_dimension_numbers<[1], [0], [0], [1], [0, 0, 1, 1], [], []>} : vector<8x256xf32>, vector<256x128xf32>, vector<8x128xf32> -> vector<8x128xf32>
    %c0_9 = arith.constant 0 : index
    %c0_10 = arith.constant 0 : index
    %10 = vector.load %arg5[%c0_9, %c0_10] : memref<1x128xf32, #tpu.memory_space<vmem>>, vector<1x128xf32>
    %11 = vector.broadcast %10 : vector<1x128xf32> to vector<8x128xf32>
    %12 = arith.addf %9, %11 : vector<8x128xf32>
    %c0_11 = arith.constant 0 : index
    %c0_12 = arith.constant 0 : index
    %13 = vector.load %arg6[%c0_11, %c0_12] : memref<128x64xf32, #tpu.memory_space<vmem>>, vector<128x64xf32>
    %cst_13 = arith.constant dense<0.000000e+00> : vector<8x64xf32>
    %14 = tpu.matmul %12, %13, %cst_13 {dimension_numbers = #tpu.dot_dimension_numbers<[1], [0], [0], [1], [0, 0, 1, 1], [], []>} : vector<8x128xf32>, vector<128x64xf32>, vector<8x64xf32> -> vector<8x64xf32>
    %c0_14 = arith.constant 0 : index
    %c0_15 = arith.constant 0 : index
    %15 = vector.load %arg7[%c0_14, %c0_15] : memref<1x64xf32, #tpu.memory_space<vmem>>, vector<1x64xf32>
    %16 = vector.broadcast %15 : vector<1x64xf32> to vector<8x64xf32>
    %17 = arith.addf %14, %16 : vector<8x64xf32>
    %c0_16 = arith.constant 0 : index
    %c0_17 = arith.constant 0 : index
    %18 = vector.load %arg8[%c0_16, %c0_17] : memref<64x32xf32, #tpu.memory_space<vmem>>, vector<64x32xf32>
    %cst_18 = arith.constant dense<0.000000e+00> : vector<8x32xf32>
    %19 = tpu.matmul %17, %18, %cst_18 {dimension_numbers = #tpu.dot_dimension_numbers<[1], [0], [0], [1], [0, 0, 1, 1], [], []>} : vector<8x64xf32>, vector<64x32xf32>, vector<8x32xf32> -> vector<8x32xf32>
    %c0_19 = arith.constant 0 : index
    %c0_20 = arith.constant 0 : index
    %20 = vector.load %arg9[%c0_19, %c0_20] : memref<1x32xf32, #tpu.memory_space<vmem>>, vector<1x32xf32>
    %21 = vector.broadcast %20 : vector<1x32xf32> to vector<8x32xf32>
    %22 = arith.addf %19, %21 : vector<8x32xf32>
    %c0_21 = arith.constant 0 : index
    %c0_22 = arith.constant 0 : index
    %23 = vector.load %arg10[%c0_21, %c0_22] : memref<32x8xf32, #tpu.memory_space<vmem>>, vector<32x8xf32>
    %cst_23 = arith.constant dense<0.000000e+00> : vector<8x8xf32>
    %24 = tpu.matmul %22, %23, %cst_23 {dimension_numbers = #tpu.dot_dimension_numbers<[1], [0], [0], [1], [0, 0, 1, 1], [], []>} : vector<8x32xf32>, vector<32x8xf32>, vector<8x8xf32> -> vector<8x8xf32>
    %c0_24 = arith.constant 0 : index
    %c0_25 = arith.constant 0 : index
    %25 = vector.load %arg11[%c0_24, %c0_25] : memref<1x8xf32, #tpu.memory_space<vmem>>, vector<1x8xf32>
    %26 = vector.broadcast %25 : vector<1x8xf32> to vector<8x8xf32>
    %27 = arith.addf %24, %26 : vector<8x8xf32>
    %c0_26 = arith.constant 0 : index
    %c0_27 = arith.constant 0 : index
    %28 = vector.load %arg12[%c0_26, %c0_27] : memref<8x8xf32, #tpu.memory_space<vmem>>, vector<8x8xf32>
    tpu.vector_store %arg12[%c0_26, %c0_27], %27 {strides = array<i32>} : memref<8x8xf32, #tpu.memory_space<vmem>>, vector<8x8xf32>,
    return
  }
  func.func @transform_0(%arg0: i32) -> (i32, i32) {
    %c0_i32 = arith.constant 0 : i32
    %c0_i32_0 = arith.constant 0 : i32
    return %arg0, %c0_i32 : i32, i32
  }
  func.func @transform_1(%arg0: i32) -> (i32, i32) {
    %c0_i32 = arith.constant 0 : i32
    %c0_i32_0 = arith.constant 0 : i32
    %c0_i32_1 = arith.constant 0 : i32
    return %c0_i32, %c0_i32_0 : i32, i32
  }
  func.func @transform_2(%arg0: i32) -> (i32, i32) {
    %c0_i32 = arith.constant 0 : i32
    %c0_i32_0 = arith.constant 0 : i32
    %c0_i32_1 = arith.constant 0 : i32
    return %c0_i32, %c0_i32_0 : i32, i32
  }
  func.func @transform_3(%arg0: i32) -> (i32, i32) {
    %c0_i32 = arith.constant 0 : i32
    %c0_i32_0 = arith.constant 0 : i32
    %c0_i32_1 = arith.constant 0 : i32
    return %c0_i32, %c0_i32_0 : i32, i32
  }
  func.func @transform_4(%arg0: i32) -> (i32, i32) {
    %c0_i32 = arith.constant 0 : i32
    %c0_i32_0 = arith.constant 0 : i32
    %c0_i32_1 = arith.constant 0 : i32
    return %c0_i32, %c0_i32_0 : i32, i32
  }
  func.func @transform_5(%arg0: i32) -> (i32, i32) {
    %c0_i32 = arith.constant 0 : i32
    %c0_i32_0 = arith.constant 0 : i32
    %c0_i32_1 = arith.constant 0 : i32
    return %c0_i32, %c0_i32_0 : i32, i32
  }
  func.func @transform_6(%arg0: i32) -> (i32, i32) {
    %c0_i32 = arith.constant 0 : i32
    %c0_i32_0 = arith.constant 0 : i32
    %c0_i32_1 = arith.constant 0 : i32
    return %c0_i32, %c0_i32_0 : i32, i32
  }
  func.func @transform_7(%arg0: i32) -> (i32, i32) {
    %c0_i32 = arith.constant 0 : i32
    %c0_i32_0 = arith.constant 0 : i32
    %c0_i32_1 = arith.constant 0 : i32
    return %c0_i32, %c0_i32_0 : i32, i32
  }
  func.func @transform_8(%arg0: i32) -> (i32, i32) {
    %c0_i32 = arith.constant 0 : i32
    %c0_i32_0 = arith.constant 0 : i32
    %c0_i32_1 = arith.constant 0 : i32
    return %c0_i32, %c0_i32_0 : i32, i32
  }
  func.func @transform_9(%arg0: i32) -> (i32, i32) {
    %c0_i32 = arith.constant 0 : i32
    %c0_i32_0 = arith.constant 0 : i32
    %c0_i32_1 = arith.constant 0 : i32
    return %c0_i32, %c0_i32_0 : i32, i32
  }
  func.func @transform_10(%arg0: i32) -> (i32, i32) {
    %c0_i32 = arith.constant 0 : i32
    %c0_i32_0 = arith.constant 0 : i32
    %c0_i32_1 = arith.constant 0 : i32
    return %c0_i32, %c0_i32_0 : i32, i32
  }
  func.func @transform_11(%arg0: i32) -> (i32, i32) {
    %c0_i32 = arith.constant 0 : i32
    %c0_i32_0 = arith.constant 0 : i32
    return %arg0, %c0_i32 : i32, i32
  }
}

</mosaic_0001>

<bundles_post_ra>
// kernel: dnn_forward.1
= control target key start
LH: loop header
LB: loop body
LE: loop exit
PB: predicated region body
PF: predicated region fallthrough
CT: control target
= control target key end

     0   :  { %16 = vsyncpa [#allocation3], 0  ;;  %s1330_s0 = inlined_call_operand.hbm [shape: f32[8,64], index: 0, kind: input, shape index: {}]   ;;  %s1331_s1 = inlined_call_operand.hbm [shape: f32[64,256], index: 1, kind: input, shape index: {}]   ;;  %s1332_s2 = inlined_call_operand.vmem [shape: f32[1,256], index: 2, kind: input, shape index: {}]   ;;  %s1333_s3 = inlined_call_operand.vmem [shape: f32[256,128], index: 3, kind: input, shape index: {}]   ;;  %s1334_s4 = inlined_call_operand.hbm [shape: f32[1,128], index: 4, kind: input, shape index: {}]   ;;  %s1335_s5 = inlined_call_operand.vmem [shape: f32[128,64], index: 5, kind: input, shape index: {}]   ;;  %s1336_s6 = inlined_call_operand.hbm [shape: f32[1,64], index: 6, kind: input, shape index: {}]   ;;  %s1337_s7 = inlined_call_operand.vmem [shape: f32[64,32], index: 7, kind: input, shape index: {}]   ;;  %s1338_s8 = inlined_call_operand.hbm [shape: f32[1,32], index: 8, kind: input, shape index: {}]   ;;  %s1339_s9 = inlined_call_operand.vmem [shape: f32[32,8], index: 9, kind: input, shape index: {}]   ;;  %s1340_s10 = inlined_call_operand.vmem [shape: f32[1,8], index: 10, kind: input, shape index: {}]   ;;  %s1341_s11 = inlined_call_operand.hbm [shape: f32[8,8], index: 11, kind: output, shape index: {}]  }
   0x1   :  { %17 = vsyncpa [#allocation6], 0 }
   0x2   :  { %18 = vsyncpa [#allocation9], 0 }
   0x3   :  { %19 = vsyncpa [#allocation4], 0  ;;  %s978_s17 = smov [#allocation5]   ;;  %s838_s21 = scalar_lea.hbm %s1331_s1, 2048 }
   0x4   :  { %s35_s18 = sshll.u32 %s978_s17, 4  ;;  %p839_p0 = scmp.ne.s32.totalorder %s1331_s1, %s838_s21  ;;  %s36_s18 = int_to_ptr.vmem [resolvable:$true] %s35_s18 }
   0x5   :  { %p842_p1 = scmp.lt.u32.totalorder %s838_s21, %s1331_s1 }
   0x7   :  { %p844_p2 = pnand %p842_p1, %p839_p0 }
   0x9   :  { %847 = shalt.err (!%p844_p2)
}
   0xa   :  { %s848_s26 = scalar_lea.vmem %s36_s18, 2048  ;;  %p853_p4 = scmp.lt.s32.totalorder %s36_s18, %s36_s18 }
   0xb   :  { %p849_p3 = scmp.ne.s32.totalorder %s36_s18, %s848_s26  ;;  %p854_p5 = scmp.lt.s32.totalorder %s848_s26, %s848_s26 }
   0xd   :  { %p855_p6 = por %p854_p5, %p853_p4 }
   0xf   :  { %p856_p7 = pnand %p855_p6, %p849_p3 }
  0x11   :  { %859 = shalt.err (!%p856_p7)
}
  0x12   :  { %s979_s27 = smov 256   ;;  %s980_s28 = smov 16  }
  0x13   :  { %41 = dma.hbm_to_vmem [thread:$0]  %s1331_s1, 2048, %s36_s18, [#allocation6], %s979_s27, %s979_s27, %s980_s28  }
  0x14   :  { %s981_s12 = smov [#allocation8]   ;;  %s982_s14 = smov [#allocation2]  }
  0x15   :  { %s64_s13 = sshll.u32 %s981_s12, 4  ;;  %s26_s15 = sshll.u32 %s982_s14, 4  ;;  %s65_s13 = int_to_ptr.vmem [resolvable:$true] %s64_s13  ;;  %s27_s15 = int_to_ptr.vmem [resolvable:$true] %s26_s15 }
  0x16   :  { %s860_s19 = scalar_lea.hbm %s1336_s6, 16 }
  0x17   :  { %p861_p8 = scmp.ne.s32.totalorder %s1336_s6, %s860_s19  ;;  %p864_p9 = scmp.lt.u32.totalorder %s860_s19, %s1336_s6 }
  0x19   :  { %p866_p10 = pnand %p864_p9, %p861_p8 }
  0x1b   :  { %869 = shalt.err (!%p866_p10)
}
  0x1c   :  { %s870_s1 = scalar_lea.vmem %s65_s13, 16  ;;  %s874_s18 = scalar_lea.vmem %s65_s13, 32 }
  0x1d   :  { %p871_p11 = scmp.ne.s32.totalorder %s65_s13, %s870_s1  ;;  %p875_p12 = scmp.lt.s32.totalorder %s65_s13, %s65_s13 }
  0x1e   :  { %p876_p13 = scmp.lt.s32.totalorder %s874_s18, %s870_s1 }
  0x20   :  { %p877_p0 = por %p876_p13, %p875_p12 }
  0x22   :  { %p878_p1 = pnand %p877_p0, %p871_p11 }
  0x24   :  { %881 = shalt.err (!%p878_p1)
}
  0x25   :  { %67 = dma.hbm_to_vmem [thread:$0]  %s1336_s6, 16, %s65_s13, [#allocation9]  }
  0x26   :  { %s882_s28 = scalar_lea.hbm %s1330_s0, 128 }
  0x27   :  { %p883_p2 = scmp.ne.s32.totalorder %s1330_s0, %s882_s28  ;;  %p886_p3 = scmp.lt.u32.totalorder %s882_s28, %s1330_s0 }
  0x29   :  { %p888_p4 = pnand %p886_p3, %p883_p2 }
  0x2b   :  { %891 = shalt.err (!%p888_p4)
}
  0x2c   :  { %s892_s16 = scalar_lea.vmem %s27_s15, 128  ;;  %p897_p6 = scmp.lt.s32.totalorder %s27_s15, %s27_s15 }
  0x2d   :  { %p893_p5 = scmp.ne.s32.totalorder %s27_s15, %s892_s16  ;;  %p898_p7 = scmp.lt.s32.totalorder %s892_s16, %s892_s16 }
  0x2f   :  { %p899_p8 = por %p898_p7, %p897_p6 }
  0x31   :  { %p900_p9 = pnand %p899_p8, %p893_p5 }
  0x33   :  { %903 = shalt.err (!%p900_p9)
}
  0x34   :  { %29 = dma.hbm_to_vmem [thread:$0]  %s1330_s0, 128, %s27_s15, [#allocation3]  }
  0x35   :  { %s983_s17 = smov [#allocation7]   ;;  %s984_s20 = smov [#allocation10]  }
  0x36   :  { %s52_s19 = sshll.u32 %s983_s17, 4  ;;  %s76_s21 = sshll.u32 %s984_s20, 4  ;;  %s53_s19 = int_to_ptr.vmem [resolvable:$true] %s52_s19  ;;  %s77_s21 = int_to_ptr.vmem [resolvable:$true] %s76_s21 }
  0x37   :  { %s904_s1 = scalar_lea.hbm %s1334_s4, 16 }
  0x38   :  { %p905_p10 = scmp.ne.s32.totalorder %s1334_s4, %s904_s1  ;;  %p908_p11 = scmp.lt.u32.totalorder %s904_s1, %s1334_s4 }
  0x3a   :  { %p910_p12 = pnand %p908_p11, %p905_p10 }
  0x3c   :  { %913 = shalt.err (!%p910_p12)
}
  0x3d   :  { %s914_s0 = scalar_lea.vmem %s53_s19, 16  ;;  %s918_s15 = scalar_lea.vmem %s53_s19, 32 }
  0x3e   :  { %p915_p13 = scmp.ne.s32.totalorder %s53_s19, %s914_s0  ;;  %p919_p0 = scmp.lt.s32.totalorder %s53_s19, %s53_s19 }
  0x3f   :  { %p920_p1 = scmp.lt.s32.totalorder %s918_s15, %s914_s0 }
  0x41   :  { %p921_p2 = por %p920_p1, %p919_p0 }
  0x43   :  { %p922_p3 = pnand %p921_p2, %p915_p13 }
  0x45   :  { %925 = shalt.err (!%p922_p3)
}
  0x46   :  { %55 = dma.hbm_to_vmem [thread:$0]  %s1334_s4, 16, %s53_s19, [#allocation6]  }
  0x47   :  { %s926_s12 = scalar_lea.hbm %s1338_s8, 16 }
  0x48   :  { %p927_p4 = scmp.ne.s32.totalorder %s1338_s8, %s926_s12  ;;  %p930_p5 = scmp.lt.u32.totalorder %s926_s12, %s1338_s8 }
  0x4a   :  { %p932_p6 = pnand %p930_p5, %p927_p4 }
  0x4c   :  { %935 = shalt.err (!%p932_p6)
}
  0x4d   :  { %s936_s17 = scalar_lea.vmem %s77_s21, 16  ;;  %s940_s20 = scalar_lea.vmem %s77_s21, 32 }
  0x4e   :  { %p937_p7 = scmp.ne.s32.totalorder %s77_s21, %s936_s17  ;;  %p941_p8 = scmp.lt.s32.totalorder %s77_s21, %s77_s21 }
  0x4f   :  { %p942_p9 = scmp.lt.s32.totalorder %s940_s20, %s936_s17 }
  0x51   :  { %p943_p10 = por %p942_p9, %p941_p8 }
  0x53   :  { %p944_p11 = pnand %p943_p10, %p937_p7 }
  0x55   :  { %947 = shalt.err (!%p944_p11)
}
  0x56   :  { %79 = dma.hbm_to_vmem [thread:$0]  %s1338_s8, 16, %s77_s21, [#allocation9]  }
  0x57   :  { %970 = dma.done.wait [#allocation3], 128  }
  0x58   :  { %971 = vsyncadd [#allocation3], 4294967168 }
  0x59   :  { %972 = dma.done.wait [#allocation6], 2064  }
  0x5a   :  { %973 = vsyncadd [#allocation6], 4294965232 }
  0x5b   :  { %974 = dma.done.wait [#allocation9], 32  }
  0x5c   :  { %975 = vsyncadd [#allocation9], 4294967264  ;;  %v985_v0 = vmov 0.0   ;;  %v101_v1 = vld [vmem:[#allocation5 + $0x8] sm:$0xff]  ;;  %v103_v2 = vld [vmem:[#allocation5 + $0x18] sm:$0xff]  ;;  %vm128_vm0 = vcmask 523264  }
  0x5d   :  { %196 = vmatprep.mubr.f32.mxu0 %v985_v0  ;;  %v100_v3 = vld [vmem:[#allocation5] sm:$0xff]  ;;  %v737_v4 = vpack.c.bf16 %v103_v2, %v101_v1  ;;  %v102_v5 = vld [vmem:[#allocation5 + $0x10] sm:$0xff]  ;;  %v105_v6 = vld [vmem:[#allocation5 + $0x28] sm:$0xff]  ;;  %vm987_vm1 = vmmov 0   ;;  %vm506_vm2 = vcmask 261120   ;;  %s988_s4 = smov [#allocation11]  }
  0x5e   :  { %v107_v7 = vld [vmem:[#allocation5 + $0x38] sm:$0xff]  ;;  %v739_v8 = vpack.c.bf16 %v102_v5, %v100_v3  ;;  %v104_v10 = vld [vmem:[#allocation5 + $0x20] sm:$0xff]  ;;  %v106_v11 = vld [vmem:[#allocation5 + $0x30] sm:$0xff]  ;;  %s588_s19 = sshll.u32 %s988_s4, 4  ;;  %vm580_vm3 = vcmask 64512   ;;  %s589_s19 = int_to_ptr.vmem [resolvable:$true] %s588_s19 }
  0x5f   :  { %v741_v9 = vpack.c.bf16 %v107_v7, %v105_v6  ;;  %v109_v12 = vld [vmem:[#allocation5 + $0x48] sm:$0xff]  ;;  %738 = vmatprep.subr.bf16.mxu0 %v737_v4  ;;  %v111_v13 = vld [vmem:[#allocation5 + $0x58] sm:$0xff]  ;;  %v743_v14 = vpack.c.bf16 %v106_v11, %v104_v10  ;;  %v108_v15 = vld [vmem:[#allocation5 + $0x40] sm:$0xff]  ;;  %p953_p13 = scmp.lt.s32.totalorder %s589_s19, %s589_s19 }
  0x60   :  { %740 = vmatpush1.bf16.msra.mxu0 %v739_v8  ;;  %v110_v16 = vld [vmem:[#allocation5 + $0x50] sm:$0xff]  ;;  %v745_v17 = vpack.c.bf16 %v111_v13, %v109_v12  ;;  %v113_v18 = vld [vmem:[#allocation5 + $0x68] sm:$0xff]  ;;  %v115_v19 = vld [vmem:[#allocation5 + $0x78] sm:$0xff] }
  0x61   :  { %742 = vmatprep.subr.bf16.mxu0 %v741_v9  ;;  %v221_v20 = vld [vmem:[%s1333_s3 + $0x80] sm:$0xff]  ;;  %v222_v21 = vld [vmem:[%s1333_s3 + $0x88] sm:$0xff]  ;;  %v223_v26 = vld [vmem:[%s1333_s3 + $0x90] sm:$0xff]  ;;  %v747_v29 = vpack.c.bf16 %v110_v16, %v108_v15  ;;  %v749_v34 = vpack.c.bf16 %v115_v19, %v113_v18 }
  0x62   :  { %v205_v22 = vld [vmem:[%s1333_s3] sm:$0xff]  ;;  %v206_v23 = vld [vmem:[%s1333_s3 + $0x8] sm:$0xff]  ;;  %v753_v24 = vpack.c.bf16 %v222_v21, %v221_v20  ;;  %v224_v27 = vld [vmem:[%s1333_s3 + $0x98] sm:$0xff] }
  0x63   :  { %v755_v25 = vpack.c.bf16 %v206_v23, %v205_v22  ;;  %v207_v28 = vld [vmem:[%s1333_s3 + $0x10] sm:$0xff]  ;;  %v757_v30 = vpack.c.bf16 %v224_v27, %v223_v26  ;;  %v208_v31 = vld [vmem:[%s1333_s3 + $0x18] sm:$0xff]  ;;  %v225_v32 = vld [vmem:[%s1333_s3 + $0xa0] sm:$0xff] }
  0x64   :  { %744 = vmatpush1.bf16.msra.mxu0 %v743_v14  ;;  %v226_v33 = vld [vmem:[%s1333_s3 + $0xa8] sm:$0xff]  ;;  %v114_v36 = vld [vmem:[#allocation5 + $0x70] sm:$0xff]  ;;  %754 = vmatprep.subr.bf16.mxu1 %v753_v24  ;;  %v759_v37 = vpack.c.bf16 %v208_v31, %v207_v28  ;;  %v209_v39 = vld [vmem:[%s1333_s3 + $0x20] sm:$0xff]  ;;  %v986_v14 = vmov 0.0|0.0  }
  0x65   :  { %746 = vmatprep.subr.bf16.mxu0 %v745_v17  ;;  %v112_v35 = vld [vmem:[#allocation5 + $0x60] sm:$0xff]  ;;  %756 = vmatpush3.bf16.msra.mxu1 %v755_v25  ;;  %v761_v38 = vpack.c.bf16 %v226_v33, %v225_v32  ;;  %v227_v42 = vld [vmem:[%s1333_s3 + $0xb0] sm:$0xff]  ;;  %v228_v43 = vld [vmem:[%s1333_s3 + $0xb8] sm:$0xff]  ;;  %v118_v33 = vlaneseq }
  0x66   :  { %758 = vmatprep.subr.bf16.mxu1 %v757_v30  ;;  %v210_v40 = vld [vmem:[%s1333_s3 + $0x28] sm:$0xff]  ;;  %v751_v41 = vpack.c.bf16 %v114_v36, %v112_v35  ;;  %v765_v45 = vpack.c.bf16 %v228_v43, %v227_v42  ;;  %v211_v46 = vld [vmem:[%s1333_s3 + $0x30] sm:$0xff]  ;;  %v212_v47 = vld [vmem:[%s1333_s3 + $0x38] sm:$0xff] }
  0x67   :  { %v763_v44 = vpack.c.bf16 %v210_v40, %v209_v39  ;;  %v99_v48 = vld [vmem:[#allocation2] sm:$0xff]  ;;  %v230_v50 = vld [vmem:[%s1333_s3 + $0xc8] sm:$0xff]  ;;  %v767_v51 = vpack.c.bf16 %v212_v47, %v211_v46  ;;  %v231_v55 = vld [vmem:[%s1333_s3 + $0xd0] sm:$0xff] }
  0x68   :  { %748 = vmatpush1.bf16.msra.mxu0 %v747_v29  ;;  %v229_v49 = vld [vmem:[%s1333_s3 + $0xc0] sm:$0xff]  ;;  %v214_v54 = vld [vmem:[%s1333_s3 + $0x48] sm:$0xff]  ;;  %v232_v56 = vld [vmem:[%s1333_s3 + $0xd8] sm:$0xff] }
  0x69   :  { %750 = vmatprep.subr.bf16.mxu0 %v749_v34  ;;  %760 = vmatpush3.bf16.msra.mxu1 %v759_v37  ;;  %v769_v52 = vpack.c.bf16 %v230_v50, %v229_v49  ;;  %v213_v53 = vld [vmem:[%s1333_s3 + $0x40] sm:$0xff]  ;;  %v773_v58 = vpack.c.bf16 %v232_v56, %v231_v55  ;;  %v215_v59 = vld [vmem:[%s1333_s3 + $0x50] sm:$0xff]  ;;  %v216_v60 = vld [vmem:[%s1333_s3 + $0x58] sm:$0xff]  ;;  %v119_v34 = vshrl.u32 %v118_v33, 7 }
  0x6a   :  { %762 = vmatprep.subr.bf16.mxu1 %v761_v38  ;;  %v771_v57 = vpack.c.bf16 %v214_v54, %v213_v53  ;;  %v233_v61 = vld [vmem:[%s1333_s3 + $0xe0] sm:$0xff]  ;;  %v234_v62 = vld [vmem:[%s1333_s3 + $0xe8] sm:$0xff]  ;;  %v775_v63 = vpack.c.bf16 %v216_v60, %v215_v59  ;;  %v235_v5 = vld [vmem:[%s1333_s3 + $0xf0] sm:$0xff] }
  0x6b   :  { %v777_v1 = vpack.c.bf16 %v234_v62, %v233_v61  ;;  %v217_v2 = vld [vmem:[%s1333_s3 + $0x60] sm:$0xff]  ;;  %v218_v3 = vld [vmem:[%s1333_s3 + $0x68] sm:$0xff]  ;;  %v236_v6 = vld [vmem:[%s1333_s3 + $0xf8] sm:$0xff]  ;;  %v120_v35 = vsub.s32 0, %v119_v34  ;;  %v124_v37 = vsub.s32 1, %v119_v34 }
  0x6c   :  { %752 = vmatpush1.bf16.msra.mxu0 %v751_v41  ;;  %v779_v4 = vpack.c.bf16 %v218_v3, %v217_v2  ;;  %v781_v7 = vpack.c.bf16 %v236_v6, %v235_v5  ;;  %v219_v8 = vld [vmem:[%s1333_s3 + $0x70] sm:$0xff]  ;;  %v220_v9 = vld [vmem:[%s1333_s3 + $0x78] sm:$0xff]  ;;  %v314_v11 = vld [vmem:[%s1335_s5] sm:$0xff] }
  0x6d   :  { %764 = vmatpush3.bf16.msra.mxu1 %v763_v44  ;;  %v783_v10 = vpack.c.bf16 %v220_v9, %v219_v8  ;;  %v315_v12 = vld [vmem:[%s1335_s5 + $0x8] sm:$0xff]  ;;  %v316_v13 = vld [vmem:[%s1335_s5 + $0x10] sm:$0xff]  ;;  %785 = vmatprep.subr.bf16.mxu0 %v986_v14  ;;  %v317_v16 = vld [vmem:[%s1335_s5 + $0x18] sm:$0xff] }
  0x6e   :  { %766 = vmatprep.subr.bf16.mxu1 %v765_v45  ;;  %v786_v15 = vpack.c.bf16 %v315_v12, %v314_v11  ;;  %v789_v17 = vpack.c.bf16 %v317_v16, %v316_v13  ;;  %v318_v18 = vld [vmem:[%s1335_s5 + $0x20] sm:$0xff]  ;;  %v319_v19 = vld [vmem:[%s1335_s5 + $0x28] sm:$0xff]  ;;  %v320_v21 = vld [vmem:[%s1335_s5 + $0x30] sm:$0xff] }
  0x6f   :  { %599 = vmatmul.mubr.msk.f32.vlgmr.msra.gmra.mrb[0].mxu0 %vm128_vm0, %v99_v48  ;;  %v792_v20 = vpack.c.bf16 %v319_v19, %v318_v18  ;;  %v321_v22 = vld [vmem:[%s1335_s5 + $0x38] sm:$0xff]  ;;  %v322_v24 = vld [vmem:[%s1335_s5 + $0x40] sm:$0xff]  ;;  %v323_v25 = vld [vmem:[%s1335_s5 + $0x48] sm:$0xff] }
  0x70   :  { %787 = vmatpush3.bf16.msra.mxu0 %v786_v15  ;;  %v795_v23 = vpack.c.bf16 %v321_v22, %v320_v21  ;;  %v798_v26 = vpack.c.bf16 %v323_v25, %v322_v24  ;;  %v324_v27 = vld [vmem:[%s1335_s5 + $0x50] sm:$0xff]  ;;  %v325_v28 = vld [vmem:[%s1335_s5 + $0x58] sm:$0xff]  ;;  %v326_v30 = vld [vmem:[%s1335_s5 + $0x60] sm:$0xff]  ;;  %704 = vmatprep.mubr.msk.f32.mxu0 %vm987_vm1, %v985_v0 }
  0x71   :  { %768 = vmatpush3.bf16.msra.mxu1 %v767_v51  ;;  %788 = vmatprep.subr.bf16.mxu0 %v986_v14  ;;  %v801_v29 = vpack.c.bf16 %v325_v28, %v324_v27  ;;  %v327_v31 = vld [vmem:[%s1335_s5 + $0x68] sm:$0xff]  ;;  %v116_v36 = vld [vmem:[%s1332_s2] sm:$0x3]  ;;  %v328_v46 = vld [vmem:[%s1335_s5 + $0x70] sm:$0xff] }
  0x72   :  { %770 = vmatprep.subr.bf16.mxu1 %v769_v52  ;;  %v804_v32 = vpack.c.bf16 %v327_v31, %v326_v30  ;;  %v121_v38 = vrot.slane %v116_v36, %v120_v35  ;;  %v125_v39 = vrot.slane %v116_v36, %v124_v37  ;;  %v329_v47 = vld [vmem:[%s1335_s5 + $0x78] sm:$0xff]  ;;  %v407_v49 = vld [vmem:[%s1337_s7] sm:$0xff]  ;;  %v408_v50 = vld [vmem:[%s1337_s7 + $0x8] sm:$0xff] }
  0x73   :  { %v807_v48 = vpack.c.bf16 %v329_v47, %v328_v46  ;;  %v409_v51 = vld [vmem:[%s1337_s7 + $0x10] sm:$0xff]  ;;  %v810_v52 = vpack.c.bf16 %v408_v50, %v407_v49  ;;  %v410_v53 = vld [vmem:[%s1337_s7 + $0x18] sm:$0xff]  ;;  %v411_v55 = vld [vmem:[%s1337_s7 + $0x20] sm:$0xff] }
  0x74   :  { %790 = vmatpush3.bf16.msra.mxu0 %v789_v17  ;;  %v813_v54 = vpack.c.bf16 %v410_v53, %v409_v51  ;;  %v412_v56 = vld [vmem:[%s1337_s7 + $0x28] sm:$0xff]  ;;  %v495_v3 = vld [vmem:[%s1339_s9] sm:$0xff]  ;;  %v497_v9 = vld [vmem:[%s1339_s9 + $0x10] sm:$0xff] }
  0x75   :  { %772 = vmatpush3.bf16.msra.mxu1 %v771_v57  ;;  %791 = vmatprep.subr.bf16.mxu0 %v986_v14  ;;  %v816_v57 = vpack.c.bf16 %v412_v56, %v411_v55  ;;  %v600_v59 = vld [vmem:[#allocation7] ss:$0 sm:$0xff]  ;;  %v602_v12 = vld [vmem:[#allocation10] ss:$0 sm:$0xff]  ;;  %v604_v16 = vld [vmem:[%s1340_s10] ss:$0 sm:$0xff] }
  0x76   :  { %774 = vmatprep.subr.bf16.mxu1 %v773_v58 }
  0x78   :  { %793 = vmatpush3.bf16.msra.mxu0 %v792_v20 }
  0x79   :  { %776 = vmatpush3.bf16.msra.mxu1 %v775_v63  ;;  %794 = vmatprep.subr.bf16.mxu0 %v986_v14  ;;  %v413_v63 = vld [vmem:[%s1337_s7 + $0x30] sm:$0xff] }
  0x7a   :  { %778 = vmatprep.subr.bf16.mxu1 %v777_v1  ;;  %v414_v1 = vld [vmem:[%s1337_s7 + $0x38] sm:$0xff] }
  0x7b   :  { %v819_v2 = vpack.c.bf16 %v414_v1, %v413_v63 }
  0x7c   :  { %796 = vmatpush3.bf16.msra.mxu0 %v795_v23 }
  0x7d   :  { %780 = vmatpush3.bf16.msra.mxu1 %v779_v4  ;;  %797 = vmatprep.subr.bf16.mxu0 %v986_v14  ;;  %v496_v4 = vld [vmem:[%s1339_s9 + $0x8] sm:$0xff] }
  0x7e   :  { %782 = vmatprep.subr.bf16.mxu1 %v781_v7  ;;  %v822_v5 = vpack.c.bf16 %v496_v4, %v495_v3 }
  0x80   :  { %799 = vmatpush3.bf16.msra.mxu0 %v798_v26 }
  0x81   :  { %784 = vmatpush3.bf16.msra.mxu1 %v783_v10  ;;  %800 = vmatprep.subr.bf16.mxu0 %v986_v14  ;;  %v498_v10 = vld [vmem:[%s1339_s9 + $0x18] sm:$0xff]  ;;  %s948_s9 = scalar_lea.vmem %s589_s19, 128 }
  0x82   :  { %809 = vmatprep.subr.bf16.mxu1 %v986_v14  ;;  %v825_v11 = vpack.c.bf16 %v498_v10, %v497_v9  ;;  %p949_p12 = scmp.ne.s32.totalorder %s589_s19, %s948_s9  ;;  %p954_p0 = scmp.lt.s32.totalorder %s948_s9, %s948_s9 }
  0x84   :  { %802 = vmatpush3.bf16.msra.mxu0 %v801_v29  ;;  %p955_p1 = por %p954_p0, %p953_p13 }
  0x85   :  { %803 = vmatprep.subr.bf16.mxu0 %v986_v14 }
  0x86   :  { %p956_p2 = pnand %p955_p1, %p949_p12 }
  0x88   :  { %805 = vmatpush3.bf16.msra.mxu0 %v804_v32 }
  0x89   :  { %806 = vmatprep.subr.bf16.mxu0 %v986_v14 }
  0x8c   :  { %808 = vmatpush3.bf16.msra.mxu0 %v807_v48 }
  0x8d   :  { %821 = vmatprep.subr.bf16.mxu0 %v986_v14 }
 0x142   :  { %v198_v40 = vpop.f32.mrb[0].mxu0 }
 0x143   :  { %v199_v41 = vadd.f32 %v198_v40, %v121_v38  ;;  %v200_v42 = vpop.f32.mrb[1].mxu0 }
 0x144   :  { %v201_v43 = vadd.f32 %v200_v42, %v125_v39 }
 0x145   :  { %v203_v45 = vmax.f32 %v199_v41, 0.0 }
 0x146   :  { %v204_v44 = vmax.f32 %v201_v43, 0.0 }
 0x148   :  { %308 = vmatprep.mubr.f32.mxu1 %v204_v44 }
 0x149   :  { %309 = vmatmul.mubr.f32.vlgmr.msra.gmra.mrb[0].mxu1 %v203_v45 }
 0x14a   :  { %723 = vmatprep.mubr.msk.f32.mxu1 %vm987_vm1, %v985_v0  ;;  %811 = vmatpush3.bf16.msra.mxu1 %v810_v52 }
 0x14b   :  { %812 = vmatprep.subr.bf16.mxu1 %v986_v14 }
 0x14e   :  { %814 = vmatpush3.bf16.msra.mxu1 %v813_v54 }
 0x14f   :  { %815 = vmatprep.subr.bf16.mxu1 %v986_v14 }
 0x152   :  { %817 = vmatpush3.bf16.msra.mxu1 %v816_v57 }
 0x153   :  { %818 = vmatprep.subr.bf16.mxu1 %v986_v14 }
 0x156   :  { %820 = vmatpush3.bf16.msra.mxu1 %v819_v2 }
 0x21c   :  { %v638_v58 = vpop.f32.mrb[0].mxu1 }
 0x21d   :  { %v639_v60 = vpop.f32.mrb[1].mxu1 }
 0x21e   :  { %v640_v61 = vadd.f32 %v639_v60, %v638_v58 }
 0x220   :  { %v311_v62 = vadd.f32 %v640_v61, %v600_v59 }
 0x222   :  { %705 = vmatmul.mubr.f32.vlgmr.msra.gmra.mrb[2].mxu0 %v311_v62 }
 0x223   :  { %734 = vmatprep.mubr.msk.f32.mxu0 %vm987_vm1, %v985_v0  ;;  %823 = vmatpush3.bf16.msra.mxu0 %v822_v5  ;;  %v601_v0 = vld [vmem:[#allocation8] ss:$0 sm:$0xff] }
 0x224   :  { %824 = vmatprep.subr.bf16.mxu0 %v986_v14 }
 0x227   :  { %826 = vmatpush3.bf16.msra.mxu0 %v825_v11 }
 0x2f5   :  { %v403_v6 = vpop.f32.mrb[2].mxu0 }
 0x2f6   :  { %v404_v7 = vadd.f32 %v601_v0, %v403_v6  ;;  %v706_v8 = vpop.f32.mrb[3].mxu0 }
 0x2f8   :  { %724 = vmatmul.mubr.msk.f32.vlgmr.msra.gmra.mrb[2].mxu1 %vm128_vm0, %v404_v7 }
 0x3cb   :  { %v491_v13 = vpop.f32.mrb[2].mxu1 }
 0x3cc   :  { %v492_v14 = vadd.f32 %v602_v12, %v491_v13  ;;  %v725_v15 = vpop.f32.mrb[3].mxu1 }
 0x3ce   :  { %735 = vmatmul.mubr.msk.f32.vlgmr.msra.gmra.mrb[4].mxu0 %vm506_vm2, %v492_v14 }
 0x4a1   :  { %v576_v17 = vpop.f32.mrb[4].mxu0 }
 0x4a2   :  { %v577_v18 = vadd.f32 %v604_v16, %v576_v17  ;;  %v736_v19 = vpop.f32.mrb[5].mxu0 }
 0x4a4   :  { %581 = vst.msk [vmem:[#allocation11] sm:$0xff] %vm580_vm3, %v577_v18 }
 0x4a5   :  { %959 = shalt.err (!%p956_p2)
}
 0x4a6   :  { %s960_s21 = scalar_lea.hbm %s1341_s11, 128 }
 0x4a7   :  { %p961_p3 = scmp.ne.s32.totalorder %s1341_s11, %s960_s21  ;;  %p964_p4 = scmp.lt.u32.totalorder %s960_s21, %s1341_s11 }
 0x4a9   :  { %p966_p5 = pnand %p964_p4, %p961_p3 }
 0x4ab   :  { %969 = shalt.err (!%p966_p5)
}
 0x4ac   :  { %591 = dma.vmem_to_hbm [thread:$0]  %s589_s19, 128, %s1341_s11, [#allocation4]  }
 0x4ad   :  { %976 = dma.done.wait [#allocation4], 128  }
 0x4ae   :  { %977 = vsyncadd [#allocation4], 4294967168 }
 0x4af   :  { %595 = vsyncpa [#allocation3], 1 }
 0x4b0   :  { %596 = vsyncpa [#allocation6], 1 }
 0x4b1   :  { %597 = vsyncpa [#allocation9], 1 }
 0x4b2   :  { %598 = vsyncpa [#allocation4], 1 }

</bundles_post_ra>
